<compile_context>
chip_gen: v5e
topology: v5e:2x2
jax: 0.10.0
libtpu: 0.0.40
codegen_flags: <defaults>
</compile_context>

<pallas_src>
import jax
import jax.numpy as jnp
from jax import lax
from jax.experimental import pallas as pl
from jax.experimental.pallas import tpu as pltpu

# ----- problem sizes (small, consistent with the module) -----
B = 2            # batch
S = 8            # sequence length
D_MODEL = 32     # d_model
NUM_HEADS = 4
HEAD_DIM = D_MODEL // NUM_HEADS       # 8
D_FF = 64        # dim_feedforward
EPS = 1e-5       # nn.LayerNorm default
N_TOK = B * S    # 16 flattened tokens
NEG_INF = -1e30
SLAB_ROWS = 152  # 147 used rows padded to a multiple of 8


def _layernorm(x, gamma, beta):
    mu = jnp.mean(x, axis=-1, keepdims=True)
    var = jnp.mean((x - mu) ** 2, axis=-1, keepdims=True)
    return (x - mu) * lax.rsqrt(var + EPS) * gamma + beta


def encoder_layer_kernel(x_ref, prm_ref, o_ref):
    x = x_ref[...].astype(jnp.float32)                 # (16, 32), rows ordered b*S + s

    # --- unpack the single lane-dense parameter slab (all static slices) ---
    cos      = prm_ref[0:16, 0:32]                     # (16, 32)
    sin      = prm_ref[0:16, 32:64]
    mask_add = prm_ref[0:16, 64:128]                   # (16, 64) additive cross-batch mask (head-packed)
    P        = prm_ref[16:48, 0:32]                    # (32, 32) signed RoPE pair-swap
    w_qk     = prm_ref[16:48, 32:96]                   # (32, 64) = [wq*scale | wk]
    wv       = prm_ref[16:48, 96:128]                  # (32, 32)
    wo       = prm_ref[48:80, 0:32]                    # (32, 32)
    w1       = prm_ref[48:80, 32:96]                   # (32, 64)
    w2       = prm_ref[80:144, 0:32]                   # (64, 32)
    mask_bd  = prm_ref[80:144, 32:64]                  # (64, 32) block-diagonal head mask (0/1)
    bq       = prm_ref[144:145, 0:32]                  # already scaled by 1/sqrt(head_dim)
    bk       = prm_ref[144:145, 32:64]
    bv       = prm_ref[144:145, 64:96]
    bo       = prm_ref[144:145, 96:128]
    g1       = prm_ref[145:146, 0:32]
    be1      = prm_ref[145:146, 32:64]
    g2       = prm_ref[145:146, 64:96]
    be2      = prm_ref[145:146, 96:128]
    bf1      = prm_ref[146:147, 0:64]
    bf2      = prm_ref[146:147, 64:96]

    # --- RoPE (interleaved pairs; signed pair-swap kept as one tiny MXU push) ---
    x_rope = x * cos + jnp.dot(x, P, preferred_element_type=jnp.float32) * sin

    # --- projections: q/k from x_rope in ONE push (scale pre-folded), v from raw x ---
    qk = jnp.dot(x_rope, w_qk, preferred_element_type=jnp.float32)       # (16, 64)
    q = qk[:, 0:D_MODEL] + bq
    k = qk[:, D_MODEL:2 * D_MODEL] + bk
    v = jnp.dot(x, wv, preferred_element_type=jnp.float32) + bv          # (16, 32)

    # --- lane-packed attention: all 4 heads via block-diagonal matmuls ---
    # kbd[h*16 + j, c] = k[j, c] if c belongs to head h else 0   (same for vbd)
    kbd = jnp.concatenate([k] * NUM_HEADS, axis=0) * mask_bd             # (64, 32)
    vbd = jnp.concatenate([v] * NUM_HEADS, axis=0) * mask_bd             # (64, 32)

    # scores: s[i, h*16 + j] = <q_h[i], k_h[j]>  -> one wide NT push
    s = lax.dot_general(q, kbd, (((1,), (1,)), ((), ())),
                        preferred_element_type=jnp.float32)              # (16, 64)
    s = s + mask_add                                                     # cross-batch -> -1e30
    s = s - jnp.max(s, axis=-1, keepdims=True)                           # one row max (valid per-head shift)
    pr = jnp.exp(s)                                                      # masked entries -> 0

    o_un  = jnp.dot(pr, vbd, preferred_element_type=jnp.float32)         # (16, 32) per-head P@V (lane-packed)
    denom = jnp.dot(pr, mask_bd, preferred_element_type=jnp.float32)     # (16, 32) per-head sums, pre-broadcast
    attn = jnp.dot(o_un / denom, wo, preferred_element_type=jnp.float32) + bo

    # --- residual + LayerNorm 1 (dropout = identity in eval) ---
    y = _layernorm(x + attn, g1, be1)

    # --- feed-forward: relu(y @ W1 + b1) @ W2 + b2 ---
    h1 = jnp.maximum(jnp.dot(y, w1, preferred_element_type=jnp.float32) + bf1, 0.0)
    ff = jnp.dot(h1, w2, preferred_element_type=jnp.float32) + bf2

    # --- residual + LayerNorm 2 ---
    z = _layernorm(y + ff, g2, be2)

    # Output kept as the (16,32) masked store (2 KB); relayout to a lane-dense shape would cost
    # more XLU work than the store saves at this size.
    o_ref[...] = z.astype(o_ref.dtype)


def transformer_encoder_layer(x, slab):
    """x: (B, S, D) float32, slab: (SLAB_ROWS, 128) float32 -> (B, S, D) float32."""
    xf = x.reshape(N_TOK, D_MODEL)                      # flatten batch into rows (free, in XLA)
    out = pl.pallas_call(
        encoder_layer_kernel,
        out_shape=jax.ShapeDtypeStruct((N_TOK, D_MODEL), x.dtype),
        # Single-shot kernel: whole arrays in VMEM, no grid, no pipelining pretence.
        in_specs=[pl.BlockSpec(memory_space=pltpu.MemorySpace.VMEM),
                  pl.BlockSpec(memory_space=pltpu.MemorySpace.VMEM)],
        out_specs=pl.BlockSpec(memory_space=pltpu.MemorySpace.VMEM),
    )(xf, slab)
    return out.reshape(B, S, D_MODEL)


# ---------------- parameter / RoPE-table construction (glue) ----------------
def make_params(key):
    ks = jax.random.split(key, 16)
    w = lambda k, shp, s=0.05: (s * jax.random.normal(k, shp)).astype(jnp.float32)

    # RoPE tables (torchtune convention, base=10000, interleaved pairs)
    theta = 1.0 / (10000.0 ** (jnp.arange(0, HEAD_DIM, 2, dtype=jnp.float32) / HEAD_DIM))
    pos = jnp.arange(S, dtype=jnp.float32)
    ang = pos[:, None] * theta[None, :]                     # (S, Hd/2)
    cos_hd = jnp.repeat(jnp.cos(ang), 2, axis=-1)           # (S, Hd) -> [c0,c0,c1,c1,..]
    sin_hd = jnp.repeat(jnp.sin(ang), 2, axis=-1)
    cos_full = jnp.tile(cos_hd, (1, NUM_HEADS)).astype(jnp.float32)   # (S, D)
    sin_full = jnp.tile(sin_hd, (1, NUM_HEADS)).astype(jnp.float32)

    # signed pairwise-rotation permutation: (x @ P)[2i] = -x[2i+1], [2i+1] = x[2i]
    P = jnp.zeros((D_MODEL, D_MODEL), jnp.float32)
    ev = jnp.arange(0, D_MODEL, 2)
    P = P.at[ev + 1, ev].set(-1.0)
    P = P.at[ev, ev + 1].set(1.0)

    return {
        "cos": cos_full, "sin": sin_full, "P": P,
        "wq": w(ks[0], (D_MODEL, D_MODEL)), "bq": w(ks[1], (1, D_MODEL), 0.01),
        "wk": w(ks[2], (D_MODEL, D_MODEL)), "bk": w(ks[3], (1, D_MODEL), 0.01),
        "wv": w(ks[4], (D_MODEL, D_MODEL)), "bv": w(ks[5], (1, D_MODEL), 0.01),
        "wo": w(ks[6], (D_MODEL, D_MODEL)), "bo": w(ks[7], (1, D_MODEL), 0.01),
        "g1": jnp.ones((1, D_MODEL), jnp.float32) + w(ks[8], (1, D_MODEL), 0.01),
        "be1": w(ks[9], (1, D_MODEL), 0.01),
        "w1": w(ks[10], (D_MODEL, D_FF)), "bf1": w(ks[11], (1, D_FF), 0.01),
        "w2": w(ks[12], (D_FF, D_MODEL)), "bf2": w(ks[13], (1, D_MODEL), 0.01),
        "g2": jnp.ones((1, D_MODEL), jnp.float32) + w(ks[14], (1, D_MODEL), 0.01),
        "be2": w(ks[15], (1, D_MODEL), 0.01),
    }


def pack_params(p):
    """Pack everything into ONE lane-dense (SLAB_ROWS, 128) f32 slab (single DMA)."""
    scale = 1.0 / (HEAD_DIM ** 0.5)
    slab = jnp.zeros((SLAB_ROWS, 128), jnp.float32)

    # RoPE tables tiled over batch so rows align with the flattened (b*S + s) token rows.
    slab = slab.at[0:16, 0:32].set(jnp.tile(p["cos"], (B, 1)))
    slab = slab.at[0:16, 32:64].set(jnp.tile(p["sin"], (B, 1)))

    # Additive cross-batch mask in head-packed score layout: (16, 64), col = h*16 + j.
    rb = jnp.arange(N_TOK) // S
    base = jnp.where(rb[:, None] == rb[None, :], 0.0, NEG_INF).astype(jnp.float32)   # (16, 16)
    slab = slab.at[0:16, 64:128].set(jnp.tile(base, (1, NUM_HEADS)))

    # Attention / FFN weights (softmax scale folded into wq, bq).
    slab = slab.at[16:48, 0:32].set(p["P"])
    slab = slab.at[16:48, 32:64].set(p["wq"] * scale)
    slab = slab.at[16:48, 64:96].set(p["wk"])
    slab = slab.at[16:48, 96:128].set(p["wv"])
    slab = slab.at[48:80, 0:32].set(p["wo"])
    slab = slab.at[48:80, 32:96].set(p["w1"])
    slab = slab.at[80:144, 0:32].set(p["w2"])

    # Block-diagonal head mask (64, 32): row h*N_TOK + j keeps head-h feature columns.
    r = jnp.arange(NUM_HEADS * N_TOK) // N_TOK
    c = jnp.arange(D_MODEL) // HEAD_DIM
    slab = slab.at[80:144, 32:64].set((r[:, None] == c[None, :]).astype(jnp.float32))

    # Bias / LayerNorm vectors, lane-dense (four 32-wide vectors per 128-lane row).
    slab = slab.at[144:145, 0:32].set(p["bq"] * scale)
    slab = slab.at[144:145, 32:64].set(p["bk"])
    slab = slab.at[144:145, 64:96].set(p["bv"])
    slab = slab.at[144:145, 96:128].set(p["bo"])
    slab = slab.at[145:146, 0:32].set(p["g1"])
    slab = slab.at[145:146, 32:64].set(p["be1"])
    slab = slab.at[145:146, 64:96].set(p["g2"])
    slab = slab.at[145:146, 96:128].set(p["be2"])
    slab = slab.at[146:147, 0:64].set(p["bf1"])
    slab = slab.at[146:147, 64:96].set(p["bf2"])
    return slab


# ---------------- pure-JAX reference (for correctness check) ----------------
def reference_forward(x, p):
    x_rope = x * p["cos"][None] + jnp.einsum("bsd,de->bse", x, p["P"]) * p["sin"][None]
    q = x_rope @ p["wq"] + p["bq"]
    k = x_rope @ p["wk"] + p["bk"]
    v = x @ p["wv"] + p["bv"]
    scale = 1.0 / (HEAD_DIM ** 0.5)
    qh = q.reshape(B, S, NUM_HEADS, HEAD_DIM).transpose(0, 2, 1, 3) * scale
    kh = k.reshape(B, S, NUM_HEADS, HEAD_DIM).transpose(0, 2, 1, 3)
    vh = v.reshape(B, S, NUM_HEADS, HEAD_DIM).transpose(0, 2, 1, 3)
    sc = qh @ kh.transpose(0, 1, 3, 2)
    a = jax.nn.softmax(sc, axis=-1)
    o = (a @ vh).transpose(0, 2, 1, 3).reshape(B, S, D_MODEL)
    attn = o @ p["wo"] + p["bo"]
    y = _layernorm(x + attn, p["g1"], p["be1"])
    ff = jnp.maximum(y @ p["w1"] + p["bf1"], 0.0) @ p["w2"] + p["bf2"]
    return _layernorm(y + ff, p["g2"], p["be2"])


if __name__ == "__main__":
    key = jax.random.PRNGKey(0)
    kx, kp = jax.random.split(key)
    x = jax.random.normal(kx, (B, S, D_MODEL), jnp.float32)
    params = make_params(kp)
    slab = pack_params(params)

    out = transformer_encoder_layer(x, slab)
    out = jax.block_until_ready(out)

    ref = jax.block_until_ready(reference_forward(x, params))
    assert out.shape == (B, S, D_MODEL)
    # Exact reciprocal restored in the softmax normalization -> expected max error ~1e-5
    # (f32 MXU passes + single-row-max softmax shift); 1e-3 kept as a safe margin.
    assert jnp.allclose(out, ref, atol=1e-3, rtol=1e-3), (
        float(jnp.max(jnp.abs(out - ref))))

    # TODO(synk): dropout is modeled as identity (inference mode); training-mode stochastic
    # dropout would need pltpu.prng_seed/prng_random_bits masks.
    print("KERNEL_OK")
</pallas_src>

<mosaic_0001>
module attributes {stable_mosaic.version = 11 : i64} {
  func.func @encoder_layer_kernel(%arg0: memref<16x32xf32, #tpu.memory_space<vmem>>, %arg1: memref<152x128xf32, #tpu.memory_space<vmem>>, %arg2: memref<16x32xf32, #tpu.memory_space<vmem>>) attributes {dimension_semantics = [], scalar_prefetch = 0 : i64, scratch_operands = 0 : i64, tpu.core_type = #tpu.core_type<tc>} {
    %c0 = arith.constant 0 : index
    %c0_0 = arith.constant 0 : index
    %0 = vector.load %arg0[%c0, %c0_0] : memref<16x32xf32, #tpu.memory_space<vmem>>, vector<16x32xf32>
    %c0_1 = arith.constant 0 : index
    %c0_2 = arith.constant 0 : index
    %1 = vector.load %arg1[%c0_1, %c0_2] : memref<152x128xf32, #tpu.memory_space<vmem>>, vector<16x32xf32>
    %c0_3 = arith.constant 0 : index
    %c32 = arith.constant 32 : index
    %2 = vector.load %arg1[%c0_3, %c32] : memref<152x128xf32, #tpu.memory_space<vmem>>, vector<16x32xf32>
    %c0_4 = arith.constant 0 : index
    %c64 = arith.constant 64 : index
    %3 = vector.load %arg1[%c0_4, %c64] : memref<152x128xf32, #tpu.memory_space<vmem>>, vector<16x64xf32>
    %c16 = arith.constant 16 : index
    %c0_5 = arith.constant 0 : index
    %4 = vector.load %arg1[%c16, %c0_5] : memref<152x128xf32, #tpu.memory_space<vmem>>, vector<32x32xf32>
    %c16_6 = arith.constant 16 : index
    %c32_7 = arith.constant 32 : index
    %5 = vector.load %arg1[%c16_6, %c32_7] : memref<152x128xf32, #tpu.memory_space<vmem>>, vector<32x64xf32>
    %c16_8 = arith.constant 16 : index
    %c96 = arith.constant 96 : index
    %6 = vector.load %arg1[%c16_8, %c96] : memref<152x128xf32, #tpu.memory_space<vmem>>, vector<32x32xf32>
    %c48 = arith.constant 48 : index
    %c0_9 = arith.constant 0 : index
    %7 = vector.load %arg1[%c48, %c0_9] : memref<152x128xf32, #tpu.memory_space<vmem>>, vector<32x32xf32>
    %c48_10 = arith.constant 48 : index
    %c32_11 = arith.constant 32 : index
    %8 = vector.load %arg1[%c48_10, %c32_11] : memref<152x128xf32, #tpu.memory_space<vmem>>, vector<32x64xf32>
    %c80 = arith.constant 80 : index
    %c0_12 = arith.constant 0 : index
    %9 = vector.load %arg1[%c80, %c0_12] : memref<152x128xf32, #tpu.memory_space<vmem>>, vector<64x32xf32>
    %c80_13 = arith.constant 80 : index
    %c32_14 = arith.constant 32 : index
    %10 = vector.load %arg1[%c80_13, %c32_14] : memref<152x128xf32, #tpu.memory_space<vmem>>, vector<64x32xf32>
    %c144 = arith.constant 144 : index
    %c0_15 = arith.constant 0 : index
    %11 = vector.load %arg1[%c144, %c0_15] : memref<152x128xf32, #tpu.memory_space<vmem>>, vector<1x32xf32>
    %c144_16 = arith.constant 144 : index
    %c32_17 = arith.constant 32 : index
    %12 = vector.load %arg1[%c144_16, %c32_17] : memref<152x128xf32, #tpu.memory_space<vmem>>, vector<1x32xf32>
    %c144_18 = arith.constant 144 : index
    %c64_19 = arith.constant 64 : index
    %13 = vector.load %arg1[%c144_18, %c64_19] : memref<152x128xf32, #tpu.memory_space<vmem>>, vector<1x32xf32>
    %c144_20 = arith.constant 144 : index
    %c96_21 = arith.constant 96 : index
    %14 = vector.load %arg1[%c144_20, %c96_21] : memref<152x128xf32, #tpu.memory_space<vmem>>, vector<1x32xf32>
    %c145 = arith.constant 145 : index
    %c0_22 = arith.constant 0 : index
    %15 = vector.load %arg1[%c145, %c0_22] : memref<152x128xf32, #tpu.memory_space<vmem>>, vector<1x32xf32>
    %c145_23 = arith.constant 145 : index
    %c32_24 = arith.constant 32 : index
    %16 = vector.load %arg1[%c145_23, %c32_24] : memref<152x128xf32, #tpu.memory_space<vmem>>, vector<1x32xf32>
    %c145_25 = arith.constant 145 : index
    %c64_26 = arith.constant 64 : index
    %17 = vector.load %arg1[%c145_25, %c64_26] : memref<152x128xf32, #tpu.memory_space<vmem>>, vector<1x32xf32>
    %c145_27 = arith.constant 145 : index
    %c96_28 = arith.constant 96 : index
    %18 = vector.load %arg1[%c145_27, %c96_28] : memref<152x128xf32, #tpu.memory_space<vmem>>, vector<1x32xf32>
    %c146 = arith.constant 146 : index
    %c0_29 = arith.constant 0 : index
    %19 = vector.load %arg1[%c146, %c0_29] : memref<152x128xf32, #tpu.memory_space<vmem>>, vector<1x64xf32>
    %c146_30 = arith.constant 146 : index
    %c64_31 = arith.constant 64 : index
    %20 = vector.load %arg1[%c146_30, %c64_31] : memref<152x128xf32, #tpu.memory_space<vmem>>, vector<1x32xf32>
    %21 = arith.mulf %0, %1 : vector<16x32xf32>
    %cst = arith.constant dense<0.000000e+00> : vector<16x32xf32>
    %22 = tpu.matmul %0, %4, %cst {dimension_numbers = #tpu.dot_dimension_numbers<[1], [0], [0], [1], [0, 0, 1, 1], [], []>} : vector<16x32xf32>, vector<32x32xf32>, vector<16x32xf32> -> vector<16x32xf32>
    %23 = arith.mulf %22, %2 : vector<16x32xf32>
    %24 = arith.addf %21, %23 : vector<16x32xf32>
    %cst_32 = arith.constant dense<0.000000e+00> : vector<16x64xf32>
    %25 = tpu.matmul %24, %5, %cst_32 {dimension_numbers = #tpu.dot_dimension_numbers<[1], [0], [0], [1], [0, 0, 1, 1], [], []>} : vector<16x32xf32>, vector<32x64xf32>, vector<16x64xf32> -> vector<16x64xf32>
    %26 = vector.extract_strided_slice %25 {offsets = [0, 0], sizes = [16, 32], strides = [1, 1]} : vector<16x64xf32> to vector<16x32xf32>
    %27 = vector.broadcast %11 : vector<1x32xf32> to vector<16x32xf32>
    %28 = arith.addf %26, %27 : vector<16x32xf32>
    %29 = vector.extract_strided_slice %25 {offsets = [0, 32], sizes = [16, 32], strides = [1, 1]} : vector<16x64xf32> to vector<16x32xf32>
    %30 = vector.broadcast %12 : vector<1x32xf32> to vector<16x32xf32>
    %31 = arith.addf %29, %30 : vector<16x32xf32>
    %cst_33 = arith.constant dense<0.000000e+00> : vector<16x32xf32>
    %32 = tpu.matmul %0, %6, %cst_33 {dimension_numbers = #tpu.dot_dimension_numbers<[1], [0], [0], [1], [0, 0, 1, 1], [], []>} : vector<16x32xf32>, vector<32x32xf32>, vector<16x32xf32> -> vector<16x32xf32>
    %33 = vector.broadcast %13 : vector<1x32xf32> to vector<16x32xf32>
    %34 = arith.addf %32, %33 : vector<16x32xf32>
    %35 = tpu.concatenate %31, %31, %31, %31 in 0 : vector<16x32xf32>, vector<16x32xf32>, vector<16x32xf32>, vector<16x32xf32> -> vector<64x32xf32>
    %36 = arith.mulf %35, %10 : vector<64x32xf32>
    %37 = tpu.concatenate %34, %34, %34, %34 in 0 : vector<16x32xf32>, vector<16x32xf32>, vector<16x32xf32>, vector<16x32xf32> -> vector<64x32xf32>
    %38 = arith.mulf %37, %10 : vector<64x32xf32>
    %cst_34 = arith.constant dense<0.000000e+00> : vector<16x64xf32>
    %39 = tpu.matmul %28, %36, %cst_34 {dimension_numbers = #tpu.dot_dimension_numbers<[1], [1], [0], [0], [0, 0, 1, 0], [], []>} : vector<16x32xf32>, vector<64x32xf32>, vector<16x64xf32> -> vector<16x64xf32>
    %40 = arith.addf %39, %3 : vector<16x64xf32>
    %cst_35 = arith.constant dense<0xFF800000> : vector<16xf32>
    %41 = vector.multi_reduction <maximumf>, %40, %cst_35 [1] : vector<16x64xf32> to vector<16xf32>
    %42 = vector.shape_cast %41 : vector<16xf32> to vector<16x1xf32>
    %43 = vector.broadcast %42 : vector<16x1xf32> to vector<16x64xf32>
    %44 = arith.subf %40, %43 : vector<16x64xf32>
    %45 = math.exp %44 : vector<16x64xf32>
    %cst_36 = arith.constant dense<0.000000e+00> : vector<16x32xf32>
    %46 = tpu.matmul %45, %38, %cst_36 {dimension_numbers = #tpu.dot_dimension_numbers<[1], [0], [0], [1], [0, 0, 1, 1], [], []>} : vector<16x64xf32>, vector<64x32xf32>, vector<16x32xf32> -> vector<16x32xf32>
    %cst_37 = arith.constant dense<0.000000e+00> : vector<16x32xf32>
    %47 = tpu.matmul %45, %10, %cst_37 {dimension_numbers = #tpu.dot_dimension_numbers<[1], [0], [0], [1], [0, 0, 1, 1], [], []>} : vector<16x64xf32>, vector<64x32xf32>, vector<16x32xf32> -> vector<16x32xf32>
    %48 = arith.divf %46, %47 : vector<16x32xf32>
    %cst_38 = arith.constant dense<0.000000e+00> : vector<16x32xf32>
    %49 = tpu.matmul %48, %7, %cst_38 {dimension_numbers = #tpu.dot_dimension_numbers<[1], [0], [0], [1], [0, 0, 1, 1], [], []>} : vector<16x32xf32>, vector<32x32xf32>, vector<16x32xf32> -> vector<16x32xf32>
    %50 = vector.broadcast %14 : vector<1x32xf32> to vector<16x32xf32>
    %51 = arith.addf %49, %50 : vector<16x32xf32>
    %52 = arith.addf %0, %51 : vector<16x32xf32>
    %cst_39 = arith.constant dense<0.000000e+00> : vector<16xf32>
    %53 = vector.multi_reduction <add>, %52, %cst_39 [1] : vector<16x32xf32> to vector<16xf32>
    %54 = vector.shape_cast %53 : vector<16xf32> to vector<16x1xf32>
    %cst_40 = arith.constant 3.200000e+01 : f32
    %55 = vector.broadcast %cst_40 : f32 to vector<16x1xf32>
    %56 = arith.divf %54, %55 : vector<16x1xf32>
    %57 = vector.broadcast %56 : vector<16x1xf32> to vector<16x32xf32>
    %58 = arith.subf %52, %57 : vector<16x32xf32>
    %59 = arith.mulf %58, %58 : vector<16x32xf32>
    %cst_41 = arith.constant dense<0.000000e+00> : vector<16xf32>
    %60 = vector.multi_reduction <add>, %59, %cst_41 [1] : vector<16x32xf32> to vector<16xf32>
    %61 = vector.shape_cast %60 : vector<16xf32> to vector<16x1xf32>
    %cst_42 = arith.constant 3.200000e+01 : f32
    %62 = vector.broadcast %cst_42 : f32 to vector<16x1xf32>
    %63 = arith.divf %61, %62 : vector<16x1xf32>
    %64 = vector.broadcast %56 : vector<16x1xf32> to vector<16x32xf32>
    %65 = arith.subf %52, %64 : vector<16x32xf32>
    %cst_43 = arith.constant 9.99999974E-6 : f32
    %66 = vector.broadcast %cst_43 : f32 to vector<16x1xf32>
    %67 = arith.addf %63, %66 : vector<16x1xf32>
    %68 = math.rsqrt %67 : vector<16x1xf32>
    %69 = vector.broadcast %68 : vector<16x1xf32> to vector<16x32xf32>
    %70 = arith.mulf %65, %69 : vector<16x32xf32>
    %71 = vector.broadcast %15 : vector<1x32xf32> to vector<16x32xf32>
    %72 = arith.mulf %70, %71 : vector<16x32xf32>
    %73 = vector.broadcast %16 : vector<1x32xf32> to vector<16x32xf32>
    %74 = arith.addf %72, %73 : vector<16x32xf32>
    %cst_44 = arith.constant dense<0.000000e+00> : vector<16x64xf32>
    %75 = tpu.matmul %74, %8, %cst_44 {dimension_numbers = #tpu.dot_dimension_numbers<[1], [0], [0], [1], [0, 0, 1, 1], [], []>} : vector<16x32xf32>, vector<32x64xf32>, vector<16x64xf32> -> vector<16x64xf32>
    %76 = vector.broadcast %19 : vector<1x64xf32> to vector<16x64xf32>
    %77 = arith.addf %75, %76 : vector<16x64xf32>
    %cst_45 = arith.constant 0.000000e+00 : f32
    %78 = vector.broadcast %cst_45 : f32 to vector<16x64xf32>
    %79 = arith.maximumf %77, %78 : vector<16x64xf32>
    %cst_46 = arith.constant dense<0.000000e+00> : vector<16x32xf32>
    %80 = tpu.matmul %79, %9, %cst_46 {dimension_numbers = #tpu.dot_dimension_numbers<[1], [0], [0], [1], [0, 0, 1, 1], [], []>} : vector<16x64xf32>, vector<64x32xf32>, vector<16x32xf32> -> vector<16x32xf32>
    %81 = vector.broadcast %20 : vector<1x32xf32> to vector<16x32xf32>
    %82 = arith.addf %80, %81 : vector<16x32xf32>
    %83 = arith.addf %74, %82 : vector<16x32xf32>
    %cst_47 = arith.constant dense<0.000000e+00> : vector<16xf32>
    %84 = vector.multi_reduction <add>, %83, %cst_47 [1] : vector<16x32xf32> to vector<16xf32>
    %85 = vector.shape_cast %84 : vector<16xf32> to vector<16x1xf32>
    %cst_48 = arith.constant 3.200000e+01 : f32
    %86 = vector.broadcast %cst_48 : f32 to vector<16x1xf32>
    %87 = arith.divf %85, %86 : vector<16x1xf32>
    %88 = vector.broadcast %87 : vector<16x1xf32> to vector<16x32xf32>
    %89 = arith.subf %83, %88 : vector<16x32xf32>
    %90 = arith.mulf %89, %89 : vector<16x32xf32>
    %cst_49 = arith.constant dense<0.000000e+00> : vector<16xf32>
    %91 = vector.multi_reduction <add>, %90, %cst_49 [1] : vector<16x32xf32> to vector<16xf32>
    %92 = vector.shape_cast %91 : vector<16xf32> to vector<16x1xf32>
    %cst_50 = arith.constant 3.200000e+01 : f32
    %93 = vector.broadcast %cst_50 : f32 to vector<16x1xf32>
    %94 = arith.divf %92, %93 : vector<16x1xf32>
    %95 = vector.broadcast %87 : vector<16x1xf32> to vector<16x32xf32>
    %96 = arith.subf %83, %95 : vector<16x32xf32>
    %cst_51 = arith.constant 9.99999974E-6 : f32
    %97 = vector.broadcast %cst_51 : f32 to vector<16x1xf32>
    %98 = arith.addf %94, %97 : vector<16x1xf32>
    %99 = math.rsqrt %98 : vector<16x1xf32>
    %100 = vector.broadcast %99 : vector<16x1xf32> to vector<16x32xf32>
    %101 = arith.mulf %96, %100 : vector<16x32xf32>
    %102 = vector.broadcast %17 : vector<1x32xf32> to vector<16x32xf32>
    %103 = arith.mulf %101, %102 : vector<16x32xf32>
    %104 = vector.broadcast %18 : vector<1x32xf32> to vector<16x32xf32>
    %105 = arith.addf %103, %104 : vector<16x32xf32>
    %c0_52 = arith.constant 0 : index
    %c0_53 = arith.constant 0 : index
    %106 = vector.load %arg2[%c0_52, %c0_53] : memref<16x32xf32, #tpu.memory_space<vmem>>, vector<16x32xf32>
    tpu.vector_store %arg2[%c0_52, %c0_53], %105 {strides = array<i32>} : memref<16x32xf32, #tpu.memory_space<vmem>>, vector<16x32xf32>,
    return
  }
}

</mosaic_0001>

<bundles_post_ra>
// kernel: tpu_custom_call.1
= control target key start
LH: loop header
LB: loop body
LE: loop exit
PB: predicated region body
PF: predicated region fallthrough
CT: control target
= control target key end

     0   :  { %7 = vsyncpa [#allocation3], 0  ;;  %s1056_s0 = inlined_call_operand.hbm [shape: f32[16,32], index: 0, kind: input, shape index: {}]   ;;  %s1057_s1 = inlined_call_operand.hbm [shape: f32[152,128], index: 1, kind: input, shape index: {}]   ;;  %s1058_s2 = inlined_call_operand.hbm [shape: f32[16,32], index: 2, kind: output, shape index: {}]  }
   0x1   :  { %8 = vsyncpa [#allocation6], 0 }
   0x2   :  { %9 = vsyncpa [#allocation4], 0  ;;  %s14_s11 = sshll.u32 %s1056_s0, 4  ;;  %s841_s12 = smov [#allocation2]   ;;  %s15_s11 = int_to_ptr.hbm [resolvable:$true] %s14_s11 }
   0x3   :  { %s16_s13 = sshll.u32 %s841_s12, 4  ;;  %s27_s16 = sshll.u32 %s1057_s1, 4  ;;  %s17_s13 = int_to_ptr.vmem [resolvable:$true] %s16_s13  ;;  %s28_s16 = int_to_ptr.hbm [resolvable:$true] %s27_s16 }
   0x4   :  { %s842_s17 = smov 128   ;;  %s843_s18 = smov 8  }
   0x5   :  { %22 = dma.hbm_to_vmem [thread:$0]  %s15_s11, 256, %s17_s13, [#allocation3], %s842_s17, %s842_s17, %s843_s18  }
   0x6   :  { %s844_s19 = smov [#allocation5]  }
   0x7   :  { %s29_s20 = sshll.u32 %s844_s19, 4  ;;  %s30_s20 = int_to_ptr.vmem [resolvable:$true] %s29_s20 }
   0x8   :  { %35 = dma.hbm_to_vmem [thread:$0]  %s28_s16, 2432, %s30_s20, [#allocation6], %s842_s17, %s842_s17, %s843_s18  }
   0x9   :  { %835 = dma.done.wait [#allocation3], 256  }
   0xa   :  { %836 = vsyncadd [#allocation3], 4294967040 }
   0xb   :  { %837 = dma.done.wait [#allocation6], 2432  }
   0xc   :  { %838 = vsyncadd [#allocation6], 4294964864  ;;  %v51_v0 = vld [vmem:[#allocation5 + $0x28] sm:$0xff]  ;;  %v50_v1 = vld [vmem:[#allocation5 + $0x20] sm:$0xff]  ;;  %s845_s0 = smov 96   ;;  %vm69_vm0 = vcmask 261120  }
   0xd   :  { %88 = vmatpush.msra.mxu0 %v51_v0  ;;  %v49_v2 = vld [vmem:[#allocation5 + $0x18] sm:$0xff]  ;;  %v48_v3 = vld [vmem:[#allocation5 + $0x10] sm:$0xff]  ;;  %v877_v4 = vpack.i.bf16 %v50_v1, %v51_v0  ;;  %v886_v7 = vld [vmem:[#allocation5] sm:$0xff]  ;;  %s846_s1 = smov 32   ;;  %s847_s21 = smov 64   ;;  %vm321_vm1 = vcmask 523264  }
   0xe   :  { %v717_v5 = vpack.i.bf16 %v48_v3, %v49_v2  ;;  %v882_v6 = vld [vmem:[#allocation2] sm:$0xff]  ;;  %v47_v8 = vld [vmem:[#allocation5 + $0x8] sm:$0xff]  ;;  %v891_v9 = vld [vmem:[#allocation2 + $0x8] sm:$0xff]  ;;  %s849_s22 = smov [#allocation7]   ;;  %s655_s26 = sshll.u32 %s1058_s2, 4  ;;  %s656_s26 = int_to_ptr.hbm [resolvable:$true] %s655_s26 }
   0xf   :  { %89 = vmatpush.msra.mxu0 %v50_v1  ;;  %713 = vrot.lane.b32.xlu0 %v877_v4, %s845_s0  ;;  %v67_v17 = vmul.f32 %v886_v7, %v882_v6  ;;  %v68_v22 = vmul.f32 %v47_v8, %v891_v9  ;;  %v742_v26 = vld [vmem:[#allocation5 + $0x90] ss:$0 sm:$0xff]  ;;  %v907_v32 = vld [vmem:[#allocation5 + $0x88] sm:$0xff]  ;;  %v909_v33 = vld [vmem:[#allocation5 + $0x78] sm:$0xff]  ;;  %s653_s23 = sshll.u32 %s849_s22, 4  ;;  %s654_s23 = int_to_ptr.vmem [resolvable:$true] %s653_s23 }
  0x10   :  { %718 = vrot.lane.b32.xlu1 %v717_v5, %s845_s0  ;;  %v900_v28 = vld [vmem:[#allocation5 + $0x70] sm:$0xff]  ;;  %v911_v34 = vld [vmem:[#allocation5 + $0x58] sm:$0xff]  ;;  %v924_v39 = vld [vmem:[#allocation5 + $0x80] sm:$0xff] }
  0x11   :  { %90 = vmatpush.msra.mxu0 %v49_v2  ;;  %v926_v40 = vld [vmem:[#allocation5 + $0x60] sm:$0xff]  ;;  %v935_v43 = vld [vmem:[#allocation5 + $0x68] sm:$0xff]  ;;  %v944_v45 = vld [vmem:[#allocation5 + $0x50] sm:$0xff] }
  0x13   :  { %91 = vmatpush.msra.mxu0 %v48_v3 }
  0x14   :  { %669 = vmatmul.msk.f32.vlgmr.msra.gmra.mxu0 %vm69_vm0, %v882_v6 }
  0x17   :  { %101 = vrot.lane.b32.xlu0 %v886_v7, %s845_s0 }
  0x18   :  { %103 = vrot.lane.b32.xlu1 %v47_v8, %s845_s0 }
  0x1c   :  { %670 = vmatmul.msk.f32.gmra.mxu0 %vm69_vm0, %v891_v9 }
  0x81   :  { %v714_v10 = vpop.permute.xlu0 %713 }
  0x82   :  { %v715_v11 = vunpack.i.l.bf16 %v714_v10  ;;  %v716_v12 = vunpack.i.h.bf16 %v714_v10  ;;  %v719_v13 = vpop.permute.xlu1 %718 }
  0x83   :  { %v720_v14 = vunpack.i.l.bf16 %v719_v13  ;;  %v721_v15 = vunpack.i.h.bf16 %v719_v13 }
  0x84   :  { %145 = vmatpush.msra.mxu1 %v715_v11 }
  0x86   :  { %146 = vmatpush.msra.mxu1 %v716_v12 }
  0x88   :  { %147 = vmatpush.msra.mxu1 %v720_v14 }
  0x89   :  { %v102_v16 = vpop.permute.xlu0 %101 }
  0x8a   :  { %148 = vmatpush.msra.mxu1 %v721_v15  ;;  %v104_v21 = vpop.permute.xlu1 %103 }
  0x91   :  { %v93_v18 = vpop.f32.mrf.mxu0 }
  0x92   :  { %v107_v19 = vmul.f32 %v102_v16, %v93_v18 }
  0x94   :  { %v109_v20 = vadd.f32 %v107_v19, %v67_v17 }
  0x96   :  { %671 = vmatmul.msk.f32.vlgmr.msra.gmra.mxu1 %vm69_vm0, %v109_v20 }
  0x99   :  { %v96_v23 = vpop.f32.mrf.mxu0 }
  0x9a   :  { %v108_v24 = vmul.f32 %v104_v21, %v96_v23 }
  0x9c   :  { %v110_v25 = vadd.f32 %v108_v24, %v68_v22 }
  0x9e   :  { %672 = vmatmul.msk.f32.gmra.mxu1 %vm69_vm0, %v110_v25 }
 0x113   :  { %v150_v27 = vpop.f32.mrf.mxu1 }
 0x114   :  { %v902_v29 = vadd.f32 %v742_v26, %v150_v27 }
 0x116   :  { %v202_v30 = vmul.f32 %v902_v29, %v900_v28  ;;  %v204_v41 = vmul.f32 %v902_v29, %v924_v39  ;;  %v200_v42 = vmul.f32 %v902_v29, %v926_v40  ;;  %v198_v46 = vmul.f32 %v902_v29, %v944_v45 }
 0x118   :  { %262 = vrot.lane.b32.xlu1 %v202_v30, %s845_s0 }
 0x11b   :  { %v153_v31 = vpop.f32.mrf.mxu1 }
 0x11c   :  { %v913_v35 = vadd.f32 %v742_v26, %v153_v31 }
 0x11e   :  { %v205_v36 = vmul.f32 %v913_v35, %v907_v32  ;;  %v203_v37 = vmul.f32 %v913_v35, %v909_v33  ;;  %v199_v38 = vmul.f32 %v913_v35, %v911_v34  ;;  %v201_v44 = vmul.f32 %v913_v35, %v935_v43 }
 0x120   :  { %268 = vrot.lane.b32.xlu2 %v205_v36, %s845_s0  ;;  %264 = vrot.lane.b32.xlu0 %v203_v37, %s845_s0 }
 0x121   :  { %256 = vrot.lane.b32.xlu1 %v199_v38, %s845_s0  ;;  %v998_v38 = vld [vmem:[#allocation5 + $0x38] sm:$0xff] }
 0x128   :  { %266 = vrot.lane.b32.xlu2 %v204_v41, %s845_s0  ;;  %258 = vrot.lane.b32.xlu0 %v200_v42, %s845_s0 }
 0x129   :  { %728 = vrot.lane.b32.xlu1 %v717_v5, %s846_s1 }
 0x130   :  { %260 = vrot.lane.b32.xlu2 %v201_v44, %s845_s0  ;;  %723 = vrot.lane.b32.xlu0 %v877_v4, %s846_s1 }
 0x131   :  { %228 = vrot.lane.b32.xlu1 %v907_v32, %s845_s0 }
 0x138   :  { %254 = vrot.lane.b32.xlu2 %v198_v46, %s845_s0  ;;  %272 = vrot.lane.b32.xlu0 %v47_v8, %s847_s21 }
 0x139   :  { %224 = vrot.lane.b32.xlu1 %v909_v33, %s845_s0 }
 0x140   :  { %270 = vrot.lane.b32.xlu2 %v886_v7, %s847_s21 }
 0x141   :  { %220 = vrot.lane.b32.xlu1 %v935_v43, %s845_s0 }
 0x148   :  { %226 = vrot.lane.b32.xlu2 %v924_v39, %s845_s0 }
 0x150   :  { %222 = vrot.lane.b32.xlu2 %v900_v28, %s845_s0 }
 0x158   :  { %218 = vrot.lane.b32.xlu2 %v926_v40, %s845_s0 }
 0x160   :  { %216 = vrot.lane.b32.xlu2 %v911_v34, %s845_s0 }
 0x168   :  { %172 = vrot.lane.b32.xlu2 %v742_v26, %s847_s21 }
 0x170   :  { %214 = vrot.lane.b32.xlu2 %v944_v45, %s845_s0 }
 0x178   :  { %416 = vrot.lane.b32.xlu2 %v742_v26, %s846_s1 }
 0x17a   :  { %v269_v47 = vpop.permute.xlu2 %268 }
 0x17b   :  { %675 = vmatpush.xpose.msk.msra.mxu3 %vm69_vm0, %v269_v47 }
 0x182   :  { %v267_v48 = vpop.permute.xlu2 %266 }
 0x183   :  { %676 = vmatpush.xpose.msk.msra.mxu3 %vm69_vm0, %v267_v48 }
 0x18a   :  { %v263_v49 = vpop.permute.xlu1 %262  ;;  %v261_v51 = vpop.permute.xlu2 %260 }
 0x192   :  { %v265_v50 = vpop.permute.xlu0 %264  ;;  %v255_v59 = vpop.permute.xlu2 %254 }
 0x193   :  { %677 = vmatpush.xpose.msk.msra.mxu3 %vm69_vm0, %v265_v50  ;;  %v257_v52 = vpop.permute.xlu1 %256 }
 0x197   :  { %678 = vmatpush.xpose.msk.msra.mxu3 %vm69_vm0, %v263_v49 }
 0x19a   :  { %v259_v53 = vpop.permute.xlu0 %258  ;;  %v271_v61 = vpop.permute.xlu2 %270 }
 0x19b   :  { %679 = vmatpush.xpose.msk.msra.mxu3 %vm69_vm0, %v261_v51  ;;  %v729_v55 = vpop.permute.xlu1 %728 }
 0x19c   :  { %v730_v58 = vunpack.i.l.bf16 %v729_v55  ;;  %v731_v60 = vunpack.i.h.bf16 %v729_v55 }
 0x19f   :  { %680 = vmatpush.xpose.msk.msra.mxu3 %vm69_vm0, %v259_v53 }
 0x1a2   :  { %v724_v54 = vpop.permute.xlu0 %723  ;;  %v227_v62 = vpop.permute.xlu2 %226 }
 0x1a3   :  { %681 = vmatpush.xpose.msk.msra.mxu3 %vm69_vm0, %v257_v52  ;;  %v725_v56 = vunpack.i.l.bf16 %v724_v54  ;;  %v726_v57 = vunpack.i.h.bf16 %v724_v54  ;;  %v229_v63 = vpop.permute.xlu1 %228 }
 0x1a4   :  { %371 = vmatpush.msrb.mxu1 %v229_v63 }
 0x1a5   :  { %187 = vmatpush.msra.mxu2 %v725_v56 }
 0x1a6   :  { %372 = vmatpush.msrb.mxu1 %v227_v62 }
 0x1a7   :  { %682 = vmatpush.xpose.msk.msra.mxu3 %vm69_vm0, %v255_v59  ;;  %188 = vmatpush.msra.mxu2 %v726_v57 }
 0x1a9   :  { %189 = vmatpush.msra.mxu2 %v730_v58 }
 0x1aa   :  { %683 = vmatmul.msk.f32.vlgmr.msra.gmra.mxu3 %vm69_vm0, %v902_v29  ;;  %v223_v0 = vpop.permute.xlu2 %222  ;;  %v273_v11 = vpop.permute.xlu0 %272 }
 0x1ab   :  { %190 = vmatpush.msra.mxu2 %v731_v60  ;;  %v225_v1 = vpop.permute.xlu1 %224 }
 0x1ac   :  { %673 = vmatmul.msk.f32.vlgmr.msra.gmra.mxu2 %vm69_vm0, %v882_v6  ;;  %373 = vmatpush.msrb.mxu1 %v225_v1 }
 0x1ae   :  { %374 = vmatpush.msrb.mxu1 %v223_v0 }
 0x1b2   :  { %684 = vmatmul.msk.f32.gmra.mxu3 %vm69_vm0, %v913_v35  ;;  %v219_v2 = vpop.permute.xlu2 %218 }
 0x1b3   :  { %v221_v3 = vpop.permute.xlu1 %220 }
 0x1b4   :  { %674 = vmatmul.msk.f32.gmra.mxu2 %vm69_vm0, %v891_v9  ;;  %375 = vmatpush.msrb.mxu1 %v221_v3 }
 0x1b6   :  { %376 = vmatpush.msrb.mxu1 %v219_v2 }
 0x1ba   :  { %v217_v10 = vpop.permute.xlu2 %216 }
 0x1bb   :  { %377 = vmatpush.msrb.mxu1 %v217_v10 }
 0x1c2   :  { %v173_v16 = vpop.permute.xlu2 %172 }
 0x1ca   :  { %v215_v26 = vpop.permute.xlu2 %214 }
 0x1cb   :  { %378 = vmatpush.msrb.mxu1 %v215_v26 }
 0x1cd   :  { %576 = vmatpush.msra.mxu1 %v907_v32 }
 0x1cf   :  { %577 = vmatpush.msra.mxu1 %v924_v39  ;;  %v1001_v39 = vld [vmem:[#allocation5 + $0x30] sm:$0xff] }
 0x1d0   :  { %v737_v41 = vpack.i.bf16 %v1001_v39, %v998_v38 }
 0x1d1   :  { %578 = vmatpush.msra.mxu1 %v909_v33  ;;  %v55_v33 = vld [vmem:[#allocation5 + $0x48] sm:$0xff] }
 0x1d3   :  { %579 = vmatpush.msra.mxu1 %v900_v28 }
 0x1d5   :  { %580 = vmatpush.msra.mxu1 %v935_v43 }
 0x1d7   :  { %581 = vmatpush.msra.mxu1 %v926_v40 }
 0x1d9   :  { %582 = vmatpush.msra.mxu1 %v911_v34  ;;  %v54_v34 = vld [vmem:[#allocation5 + $0x40] sm:$0xff] }
 0x1da   :  { %v732_v40 = vpack.i.bf16 %v54_v34, %v55_v33 }
 0x1db   :  { %583 = vmatpush.msra.mxu1 %v944_v45 }
 0x22d   :  { %v315_v4 = vpop.f32.mrf.mxu3 }
 0x22e   :  { %v316_v5 = vadd.f32 %v315_v4, %v271_v61  ;;  %v417_v4 = vpop.permute.xlu2 %416 }
 0x22f   :  { %v192_v7 = vpop.f32.mrf.mxu2 }
 0x230   :  { %v322_v8 = vsel %vm321_vm1, %v316_v5, -inf  ;;  %v193_v17 = vadd.f32 %v192_v7, %v173_v16 }
 0x231   :  { %323 = vmax.xlane.f32.xlu0 %v322_v8 }
 0x232   :  { %v244_v20 = vmul.f32 %v227_v62, %v193_v17  ;;  %v242_v22 = vmul.f32 %v223_v0, %v193_v17  ;;  %v240_v24 = vmul.f32 %v219_v2, %v193_v17  ;;  %v238_v27 = vmul.f32 %v215_v26, %v193_v17 }
 0x235   :  { %v318_v12 = vpop.f32.mrf.mxu3 }
 0x236   :  { %v319_v13 = vadd.f32 %v318_v12, %v273_v11 }
 0x237   :  { %v195_v14 = vpop.f32.mrf.mxu2 }
 0x238   :  { %v325_v15 = vsel %vm321_vm1, %v319_v13, -inf  ;;  %v196_v18 = vadd.f32 %v195_v14, %v173_v16 }
 0x239   :  { %326 = vmax.xlane.f32.xlu1 %v325_v15  ;;  %v848_v15 = vmov 32.0  }
 0x23a   :  { %v245_v19 = vmul.f32 %v229_v63, %v196_v18  ;;  %v243_v21 = vmul.f32 %v225_v1, %v196_v18  ;;  %v241_v23 = vmul.f32 %v221_v3, %v196_v18  ;;  %v239_v25 = vmul.f32 %v217_v10, %v196_v18  ;;  %v1013_v18 = vld [vmem:[#allocation5 + $0x91] ss:$0 sm:$0xff] }
 0x23c   :  { %348 = vmatpush.msrb.mxu0 %v245_v19  ;;  %695 = vmatpush.msrb.mxu2 %v245_v19 }
 0x23e   :  { %349 = vmatpush.msrb.mxu0 %v244_v20  ;;  %696 = vmatpush.msrb.mxu2 %v244_v20 }
 0x240   :  { %350 = vmatpush.msrb.mxu0 %v243_v21  ;;  %697 = vmatpush.msrb.mxu2 %v243_v21 }
 0x242   :  { %351 = vmatpush.msrb.mxu0 %v242_v22  ;;  %698 = vmatpush.msrb.mxu2 %v242_v22 }
 0x244   :  { %352 = vmatpush.msrb.mxu0 %v241_v23  ;;  %699 = vmatpush.msrb.mxu2 %v241_v23 }
 0x246   :  { %353 = vmatpush.msrb.mxu0 %v240_v24  ;;  %700 = vmatpush.msrb.mxu2 %v240_v24 }
 0x248   :  { %354 = vmatpush.msrb.mxu0 %v239_v25  ;;  %701 = vmatpush.msrb.mxu2 %v239_v25 }
 0x24a   :  { %355 = vmatpush.msrb.mxu0 %v238_v27  ;;  %702 = vmatpush.msrb.mxu2 %v238_v27 }
 0x24c   :  { %437 = vmatpush.msra.mxu2 %v55_v33 }
 0x24e   :  { %438 = vmatpush.msra.mxu2 %v54_v34 }
 0x250   :  { %439 = vmatpush.msra.mxu2 %v998_v38 }
 0x252   :  { %440 = vmatpush.msra.mxu2 %v1001_v39  ;;  %733 = vrot.lane.b32.xlu1 %v732_v40, %s845_s0 }
 0x25a   :  { %505 = vrot.lane.b32.xlu1 %v1013_v18, %s845_s0 }
 0x2a4   :  { %v324_v29 = vpop.xlane.xlu0 %323 }
 0x2a5   :  { %v328_v30 = vsub.f32 %v316_v5, %v324_v29 }
 0x2a7   :  { %v330_v31 = vmul.f32 1.442695, %v328_v30 }
 0x2a9   :  { %745 = vpow2.f32 %v330_v31 }
 0x2ac   :  { %v327_v32 = vpop.xlane.xlu1 %326 }
 0x2ad   :  { %v329_v35 = vsub.f32 %v319_v13, %v327_v32 }
 0x2af   :  { %v746_v36 = vpop.eup %745  ;;  %v332_v37 = vmul.f32 1.442695, %v329_v35 }
 0x2b0   :  { %685 = vmatmul.msk.f32.vlgmr.msrb.gmra.mxu0 %vm321_vm1, %v746_v36  ;;  %687 = vmatmul.msk.f32.vlgmr.msrb.gmra.mxu1 %vm321_vm1, %v746_v36 }
 0x2b1   :  { %747 = vpow2.f32 %v332_v37 }
 0x2b7   :  { %v748_v28 = vpop.eup %747 }
 0x2b8   :  { %686 = vmatmul.msk.f32.vlgmr.msrb.gmra.mxu2 %vm321_vm1, %v748_v28  ;;  %688 = vmatmul.msk.f32.gmra.mxu1 %vm321_vm1, %v748_v28 }
 0x2c4   :  { %v734_v32 = vpop.permute.xlu1 %733 }
 0x2c5   :  { %v735_v35 = vunpack.i.l.bf16 %v734_v32  ;;  %v736_v36 = vunpack.i.h.bf16 %v734_v32 }
 0x2c7   :  { %545 = vmatpush.msra.mxu0 %v735_v35 }
 0x2c9   :  { %546 = vmatpush.msra.mxu0 %v736_v36 }
 0x32d   :  { %v380_v42 = vpop.f32.mrf.mxu1  ;;  %v357_v55 = vpop.f32.mrf.mxu0 }
 0x32e   :  { %749 = vrcp.f32 %v380_v42  ;;  %v397_v47 = vand.u32 2147483648, %v380_v42  ;;  %v395_v49 = vand.u32 2147483647, %v380_v42  ;;  %vm391_vm3 = vweird.f32 %v380_v42 }
 0x330   :  { %v398_v52 = vor.u32 1.1754944e-38, %v397_v47  ;;  %vm396_vm5 = vcmp.eq.f32.partialorder %v395_v49, 8.507059e+37 }
 0x334   :  { %v750_v43 = vpop.eup %749 }
 0x335   :  { %v387_v44 = vmul.f32 %v750_v43, %v380_v42  ;;  %v383_v45 = vpop.f32.mrf.mxu1  ;;  %vm392_vm2 = vweird.f32 %v750_v43  ;;  %v744_v42 = vld [vmem:[#allocation5 + $0x92] ss:$0 sm:$0xff] }
 0x336   :  { %751 = vrcp.f32 %v383_v45  ;;  %vm393_vm4 = vmor %vm391_vm3, %vm392_vm2  ;;  %v412_v59 = vand.u32 2147483648, %v383_v45  ;;  %v410_v61 = vand.u32 2147483647, %v383_v45  ;;  %vm406_vm7 = vweird.f32 %v383_v45 }
 0x337   :  { %v388_v46 = vsub.f32 1.0, %v387_v44  ;;  %753 = vrcp.f32 %v848_v15 }
 0x338   :  { %v413_v63 = vor.u32 1.1754944e-38, %v412_v59  ;;  %vm411_vm9 = vcmp.eq.f32.partialorder %v410_v61, 8.507059e+37 }
 0x339   :  { %v389_v48 = vmul.f32 %v750_v43, %v388_v46 }
 0x33b   :  { %v390_v50 = vadd.f32 %v750_v43, %v389_v48  ;;  %v360_v1 = vpop.f32.mrf.mxu2 }
 0x33c   :  { %v752_v51 = vpop.eup %751 }
 0x33d   :  { %v394_v53 = vsel %vm393_vm4, %v750_v43, %v390_v50  ;;  %v402_v54 = vmul.f32 %v752_v51, %v383_v45  ;;  %vm407_vm6 = vweird.f32 %v752_v51  ;;  %v754_v16 = vpop.eup %753 }
 0x33e   :  { %v399_v56 = vsel %vm396_vm5, %v398_v52, %v394_v53  ;;  %vm408_vm8 = vmor %vm406_vm7, %vm407_vm6  ;;  %v457_v17 = vmul.f32 32.0, %v754_v16  ;;  %vm461_vm10 = vweird.f32 %v754_v16 }
 0x33f   :  { %v403_v57 = vsub.f32 1.0, %v402_v54  ;;  %v400_v58 = vmul.f32 %v399_v56, %v357_v55 }
 0x340   :  { %v458_v19 = vsub.f32 1.0, %v457_v17 }
 0x341   :  { %v404_v60 = vmul.f32 %v752_v51, %v403_v57  ;;  %689 = vmatmul.msk.f32.vlgmr.msra.gmra.mxu2 %vm69_vm0, %v400_v58  ;;  %v506_v57 = vpop.permute.xlu1 %505 }
 0x343   :  { %v405_v62 = vadd.f32 %v752_v51, %v404_v60 }
 0x345   :  { %v409_v0 = vsel %vm408_vm8, %v752_v51, %v405_v62 }
 0x346   :  { %v414_v2 = vsel %vm411_vm9, %v413_v63, %v409_v0 }
 0x347   :  { %v415_v3 = vmul.f32 %v414_v2, %v360_v1 }
 0x349   :  { %690 = vmatmul.msk.f32.gmra.mxu2 %vm69_vm0, %v415_v3 }
 0x3c4   :  { %v442_v5 = vpop.f32.mrf.mxu2 }
 0x3c5   :  { %v443_v7 = vadd.f32 %v442_v5, %v417_v4 }
 0x3c7   :  { %v448_v8 = vadd.f32 %v443_v7, %v882_v6  ;;  %v459_v6 = vmul.f32 %v754_v16, %v458_v19 }
 0x3c9   :  { %v450_v10 = vsel %vm69_vm0, %v448_v8, 0.0  ;;  %v460_v20 = vadd.f32 %v754_v16, %v459_v6 }
 0x3ca   :  { %451 = vadd.xlane.f32.xlu0 %v450_v10 }
 0x3cb   :  { %v1017_v21 = vsel %vm461_vm10, %v754_v16, %v460_v20 }
 0x3cc   :  { %v445_v11 = vpop.f32.mrf.mxu2 }
 0x3cd   :  { %v446_v12 = vadd.f32 %v445_v11, %v417_v4 }
 0x3cf   :  { %v449_v13 = vadd.f32 %v446_v12, %v891_v9 }
 0x3d1   :  { %v453_v14 = vsel %vm69_vm0, %v449_v13, 0.0 }
 0x3d2   :  { %454 = vadd.xlane.f32.xlu2 %v453_v14 }
 0x43d   :  { %v452_v22 = vpop.xlane.xlu0 %451 }
 0x43e   :  { %v463_v9 = vmul.f32 %v1017_v21, %v452_v22 }
 0x440   :  { %v465_v23 = vsub.f32 %v448_v8, %v463_v9 }
 0x442   :  { %v467_v24 = vmul.f32 %v465_v23, %v465_v23 }
 0x444   :  { %v469_v25 = vsel %vm69_vm0, %v467_v24, 0.0 }
 0x445   :  { %v455_v26 = vpop.xlane.xlu2 %454  ;;  %470 = vadd.xlane.f32.xlu0 %v469_v25 }
 0x446   :  { %v464_v27 = vmul.f32 %v1017_v21, %v455_v26 }
 0x448   :  { %v466_v29 = vsub.f32 %v449_v13, %v464_v27 }
 0x44a   :  { %v468_v30 = vmul.f32 %v466_v29, %v466_v29 }
 0x44c   :  { %v472_v31 = vsel %vm69_vm0, %v468_v30, 0.0 }
 0x44d   :  { %473 = vadd.xlane.f32.xlu0 %v472_v31 }
 0x461   :  { %738 = vrot.lane.b32.xlu0 %v737_v41, %s845_s0 }
 0x469   :  { %559 = vrot.lane.b32.xlu0 %v744_v42, %s847_s21 }
 0x4b8   :  { %v471_v37 = vpop.xlane.xlu0 %470 }
 0x4b9   :  { %v475_v28 = vmul.f32 %v471_v37, %v1017_v21 }
 0x4bb   :  { %v477_v33 = vadd.f32 1e-05, %v475_v28 }
 0x4bd   :  { %755 = vrsqrt.f32 %v477_v33  ;;  %vm485_vm12 = vweird.f32 %v477_v33 }
 0x4c0   :  { %v474_v34 = vpop.xlane.xlu0 %473 }
 0x4c1   :  { %v476_v40 = vmul.f32 %v474_v34, %v1017_v21 }
 0x4c3   :  { %v756_v43 = vpop.eup %755  ;;  %v478_v44 = vadd.f32 1e-05, %v476_v40 }
 0x4c4   :  { %v480_v38 = vmul.f32 %v756_v43, %v477_v33  ;;  %vm486_vm11 = vweird.f32 %v756_v43 }
 0x4c5   :  { %757 = vrsqrt.f32 %v478_v44  ;;  %vm487_vm13 = vmor %vm485_vm12, %vm486_vm11  ;;  %vm495_vm15 = vweird.f32 %v478_v44 }
 0x4c6   :  { %v481_v39 = vmul.f32 %v756_v43, %v480_v38 }
 0x4c8   :  { %v482_v41 = vmul.f32 0.5, %v481_v39 }
 0x4ca   :  { %v483_v45 = vsub.f32 1.5, %v482_v41 }
 0x4cb   :  { %v758_v46 = vpop.eup %757 }
 0x4cc   :  { %v484_v47 = vmul.f32 %v756_v43, %v483_v45  ;;  %v490_v48 = vmul.f32 %v758_v46, %v478_v44  ;;  %vm496_vm14 = vweird.f32 %v758_v46 }
 0x4cd   :  { %vm497_vm2 = vmor %vm495_vm15, %vm496_vm14 }
 0x4ce   :  { %v491_v49 = vmul.f32 %v758_v46, %v490_v48  ;;  %v488_v50 = vsel %vm487_vm13, %v756_v43, %v484_v47 }
 0x4cf   :  { %v499_v51 = vmul.f32 %v488_v50, %v465_v23 }
 0x4d0   :  { %v492_v52 = vmul.f32 0.5, %v491_v49 }
 0x4d1   :  { %v502_v54 = vmul.f32 %v1013_v18, %v499_v51 }
 0x4d2   :  { %v493_v53 = vsub.f32 1.5, %v492_v52 }
 0x4d3   :  { %v739_v55 = vpop.permute.xlu0 %738  ;;  %v508_v62 = vadd.f32 %v506_v57, %v502_v54 }
 0x4d4   :  { %v494_v56 = vmul.f32 %v758_v46, %v493_v53  ;;  %v740_v58 = vunpack.i.l.bf16 %v739_v55  ;;  %v741_v60 = vunpack.i.h.bf16 %v739_v55 }
 0x4d6   :  { %v498_v59 = vsel %vm497_vm2, %v758_v46, %v494_v56  ;;  %547 = vmatpush.msra.mxu0 %v740_v58 }
 0x4d7   :  { %v500_v61 = vmul.f32 %v498_v59, %v466_v29 }
 0x4d8   :  { %548 = vmatpush.msra.mxu0 %v741_v60 }
 0x4d9   :  { %691 = vmatmul.msk.f32.vlgmr.msra.gmra.mxu0 %vm69_vm0, %v508_v62  ;;  %v503_v63 = vmul.f32 %v1013_v18, %v500_v61 }
 0x4db   :  { %v509_v0 = vadd.f32 %v506_v57, %v503_v63  ;;  %v560_v8 = vpop.permute.xlu0 %559 }
 0x4e1   :  { %692 = vmatmul.msk.f32.gmra.mxu0 %vm69_vm0, %v509_v0 }
 0x556   :  { %v550_v1 = vpop.f32.mrf.mxu0 }
 0x557   :  { %v551_v2 = vadd.f32 %v744_v42, %v550_v1 }
 0x559   :  { %v556_v3 = vmax.f32 %v551_v2, 0.0 }
 0x55b   :  { %693 = vmatmul.msk.f32.vlgmr.msra.gmra.mxu1 %vm321_vm1, %v556_v3 }
 0x55e   :  { %v553_v4 = vpop.f32.mrf.mxu0 }
 0x55f   :  { %v554_v5 = vadd.f32 %v744_v42, %v553_v4 }
 0x561   :  { %v557_v7 = vmax.f32 %v554_v5, 0.0 }
 0x563   :  { %694 = vmatmul.msk.f32.gmra.mxu1 %vm321_vm1, %v557_v7 }
 0x5d8   :  { %v585_v10 = vpop.f32.mrf.mxu1 }
 0x5d9   :  { %v586_v11 = vadd.f32 %v585_v10, %v560_v8 }
 0x5db   :  { %v591_v12 = vadd.f32 %v586_v11, %v508_v62 }
 0x5dd   :  { %v593_v13 = vsel %vm69_vm0, %v591_v12, 0.0 }
 0x5de   :  { %594 = vadd.xlane.f32.xlu2 %v593_v13 }
 0x5e0   :  { %v588_v14 = vpop.f32.mrf.mxu1 }
 0x5e1   :  { %v589_v15 = vadd.f32 %v588_v14, %v560_v8 }
 0x5e3   :  { %v592_v16 = vadd.f32 %v589_v15, %v509_v0 }
 0x5e5   :  { %v596_v17 = vsel %vm69_vm0, %v592_v16, 0.0 }
 0x5e6   :  { %597 = vadd.xlane.f32.xlu1 %v596_v17 }
 0x5f6   :  { %637 = vrot.lane.b32.xlu2 %v1013_v18, %s847_s21 }
 0x651   :  { %v595_v19 = vpop.xlane.xlu2 %594 }
 0x652   :  { %v599_v6 = vmul.f32 %v595_v19, %v1017_v21 }
 0x654   :  { %v601_v20 = vsub.f32 %v591_v12, %v599_v6 }
 0x656   :  { %v603_v22 = vmul.f32 %v601_v20, %v601_v20 }
 0x658   :  { %v605_v9 = vsel %vm69_vm0, %v603_v22, 0.0 }
 0x659   :  { %v598_v23 = vpop.xlane.xlu1 %597  ;;  %606 = vadd.xlane.f32.xlu0 %v605_v9  ;;  %v638_v29 = vpop.permute.xlu2 %637 }
 0x65a   :  { %v600_v24 = vmul.f32 %v598_v23, %v1017_v21 }
 0x65c   :  { %v602_v25 = vsub.f32 %v592_v16, %v600_v24 }
 0x65e   :  { %v604_v26 = vmul.f32 %v602_v25, %v602_v25 }
 0x660   :  { %v608_v27 = vsel %vm69_vm0, %v604_v26, 0.0 }
 0x661   :  { %609 = vadd.xlane.f32.xlu2 %v608_v27 }
 0x679   :  { %642 = vrot.lane.b32.xlu2 %v1013_v18, %s846_s1 }
 0x6cc   :  { %v607_v30 = vpop.xlane.xlu0 %606 }
 0x6cd   :  { %v611_v31 = vmul.f32 %v607_v30, %v1017_v21 }
 0x6cf   :  { %v613_v32 = vadd.f32 1e-05, %v611_v31 }
 0x6d1   :  { %759 = vrsqrt.f32 %v613_v32  ;;  %vm621_vm3 = vweird.f32 %v613_v32 }
 0x6d4   :  { %v610_v35 = vpop.xlane.xlu2 %609 }
 0x6d5   :  { %v612_v36 = vmul.f32 %v610_v35, %v1017_v21 }
 0x6d7   :  { %v760_v37 = vpop.eup %759  ;;  %v614_v28 = vadd.f32 1e-05, %v612_v36 }
 0x6d8   :  { %v616_v33 = vmul.f32 %v760_v37, %v613_v32  ;;  %vm622_vm1 = vweird.f32 %v760_v37 }
 0x6d9   :  { %761 = vrsqrt.f32 %v614_v28  ;;  %vm623_vm4 = vmor %vm621_vm3, %vm622_vm1  ;;  %vm631_vm6 = vweird.f32 %v614_v28 }
 0x6da   :  { %v617_v34 = vmul.f32 %v760_v37, %v616_v33 }
 0x6dc   :  { %v618_v40 = vmul.f32 0.5, %v617_v34  ;;  %v643_v46 = vpop.permute.xlu2 %642 }
 0x6de   :  { %v619_v42 = vsub.f32 1.5, %v618_v40 }
 0x6df   :  { %v762_v43 = vpop.eup %761 }
 0x6e0   :  { %v626_v18 = vmul.f32 %v762_v43, %v614_v28  ;;  %v620_v44 = vmul.f32 %v760_v37, %v619_v42  ;;  %vm632_vm5 = vweird.f32 %v762_v43 }
 0x6e1   :  { %vm633_vm7 = vmor %vm631_vm6, %vm632_vm5 }
 0x6e2   :  { %v627_v38 = vmul.f32 %v762_v43, %v626_v18  ;;  %v624_v39 = vsel %vm623_vm4, %v760_v37, %v620_v44 }
 0x6e3   :  { %v635_v41 = vmul.f32 %v624_v39, %v601_v20 }
 0x6e4   :  { %v628_v45 = vmul.f32 0.5, %v627_v38 }
 0x6e5   :  { %v640_v47 = vmul.f32 %v638_v29, %v635_v41 }
 0x6e6   :  { %v629_v21 = vsub.f32 1.5, %v628_v45 }
 0x6e7   :  { %v645_v48 = vadd.f32 %v643_v46, %v640_v47 }
 0x6e8   :  { %v630_v49 = vmul.f32 %v762_v43, %v629_v21 }
 0x6e9   :  { %647 = vst.msk [vmem:[#allocation7] sm:$0xff] %vm69_vm0, %v645_v48 }
 0x6ea   :  { %v634_v50 = vsel %vm633_vm7, %v762_v43, %v630_v49 }
 0x6eb   :  { %v636_v51 = vmul.f32 %v634_v50, %v602_v25 }
 0x6ed   :  { %v641_v52 = vmul.f32 %v638_v29, %v636_v51 }
 0x6ef   :  { %v646_v53 = vadd.f32 %v643_v46, %v641_v52 }
 0x6f1   :  { %648 = vst.msk [vmem:[#allocation7 + $0x8] sm:$0xff] %vm69_vm0, %v646_v53 }
 0x6f2   :  { %661 = dma.vmem_to_hbm [thread:$0]  %s654_s23, 256, %s656_s26, [#allocation4], %s842_s17, %s842_s17, %s843_s18  }
 0x6f3   :  { %839 = dma.done.wait [#allocation4], 256  }
 0x6f4   :  { %840 = vsyncadd [#allocation4], 4294967040 }
 0x6f5   :  { %666 = vsyncpa [#allocation3], 1 }
 0x6f6   :  { %667 = vsyncpa [#allocation6], 1 }
 0x6f7   :  { %668 = vsyncpa [#allocation4], 1 }

</bundles_post_ra>
